<compile_context>
chip_gen: v7x
topology: tpu7x:2x2x1
jax: 0.10.0
libtpu: 0.0.40
codegen_flags: <defaults>
</compile_context>

<pallas_src>
import math

import jax
import jax.numpy as jnp
from jax.experimental import pallas as pl
from jax.experimental.pallas import tpu as pltpu


LANES = 128          # lane width; small feature dims are padded up to this
MORPH_DIM = 24       # cv2 morphological feature vector length (from the PyTorch spec)


def hybrid_kernel(x_ref, morph_ref,
                  wb_ref, bb_ref,                # frozen base model (pool+linear, folded)
                  wbp_ref, bbp_ref,              # base_proj  : 64 -> 128
                  wmp_ref, bmp_ref,              # morph_proj : 24(padded 128) -> 128
                  wg1b_ref, wg1m_ref, bg1_ref,   # gate Linear(256, 64), split halves
                  wg2_ref, bg2_ref,              # gate Linear(64, 1) as a row vector
                  wc1_ref, bc1_ref,              # classifier Linear(128, 64)
                  wc2_ref, bc2_ref,              # classifier Linear(64, C) padded to 128 lanes
                  out_ref):
    f32 = jnp.float32

    # --- frozen base model: spatial mean + Linear(Cin, 64) folded into a single
    #     (TB, Cin*H*W) @ (Cin*H*W, 64) bf16 matmul with f32 accumulation.
    base_out = jnp.dot(x_ref[...], wb_ref[...],
                       preferred_element_type=f32) + bb_ref[...]            # (TB, 64)

    # --- projections
    base_proj = jnp.dot(base_out, wbp_ref[...],
                        preferred_element_type=f32) + bbp_ref[...]          # (TB, 128)
    morph_proj = jnp.dot(morph_ref[...], wmp_ref[...],
                         preferred_element_type=f32) + bmp_ref[...]         # (TB, 128)

    # --- gate: Linear(256,64) on concat([base_proj, morph_proj]) == split matmuls
    g = (jnp.dot(base_proj, wg1b_ref[...], preferred_element_type=f32)
         + jnp.dot(morph_proj, wg1m_ref[...], preferred_element_type=f32)
         + bg1_ref[...])
    g = jnp.maximum(g, 0.0)                                                 # ReLU

    # N=1 Linear(64, 1): VPU multiply + lane reduction instead of an MXU pass
    gate_logit = jnp.sum(g * wg2_ref[...], axis=-1, keepdims=True) + bg2_ref[...]
    gate_w = jax.nn.sigmoid(gate_logit)                                     # (TB, 1)

    # --- gated fusion
    gated = gate_w * morph_proj + (1.0 - gate_w) * base_proj                # (TB, 128)

    # --- classifier head (output padded to 128 lanes -> unmasked lane-dense store)
    h = jnp.maximum(jnp.dot(gated, wc1_ref[...],
                            preferred_element_type=f32) + bc1_ref[...], 0.0)
    out_ref[...] = jnp.dot(h, wc2_ref[...],
                           preferred_element_type=f32) + bc2_ref[...]       # (TB, 128)


def _pick_batch_tile(batch, row_bytes, target_tile_bytes=6 * 1024 * 1024):
    """Batch tile so the (double-buffered) x tile fits comfortably in scoped VMEM
    on all of v5e / v6e / v7x (~6 MiB per tile, 2 buffers => ~12 MiB + tiny weights)."""
    tb = min(256, max(1, target_tile_bytes // max(1, row_bytes)))
    tb = max(8, (tb // 8) * 8)           # sublane-dense batch tiles
    if batch <= tb:
        return batch                      # full-dim block (always a legal block shape)
    return tb


def hybrid_forward(x, morph, params, num_classes):
    B, Cin, H, W = x.shape
    hw = H * W
    feat = Cin * hw

    # Image as a lane-dense 2D slab, bf16 to halve HBM traffic on the dominant input.
    x2 = x.reshape(B, feat).astype(jnp.bfloat16)

    # Fold the spatial mean into the frozen base-model weight:
    #   mean_s(x)[b] @ wb  ==  x2[b] @ (repeat(wb, HW, axis=0) / HW)
    wb_big = (jnp.repeat(params["wb"], hw, axis=0) / float(hw)).astype(jnp.bfloat16)

    # Zero-pad lane-sparse tensors up to 128 lanes (dense vregs / unmasked stores).
    morph_p = jnp.pad(morph.astype(jnp.float32), ((0, 0), (0, LANES - MORPH_DIM)))
    wmp_p = jnp.pad(params["wmp"], ((0, LANES - MORPH_DIM), (0, 0)))          # (128, 128)
    wc2_p = jnp.pad(params["wc2"], ((0, 0), (0, LANES - num_classes)))        # (64, 128)
    bc2_p = jnp.pad(params["bc2"], ((0, 0), (0, LANES - num_classes)))        # (1, 128)
    wg2_row = params["wg2"].T                                                 # (1, 64)

    # Batch tiling: auto double-buffered HBM->VMEM pipeline over batch tiles.
    tb = _pick_batch_tile(B, feat * 2)
    b_pad = pl.cdiv(B, tb) * tb
    if b_pad != B:
        x2 = jnp.pad(x2, ((0, b_pad - B), (0, 0)))
        morph_p = jnp.pad(morph_p, ((0, b_pad - B), (0, 0)))
    grid = (b_pad // tb,)

    weights = (wb_big, params["bb"],
               params["wbp"], params["bbp"],
               wmp_p, params["bmp"],
               params["wg1b"], params["wg1m"], params["bg1"],
               wg2_row, params["bg2"],
               params["wc1"], params["bc1"],
               wc2_p, bc2_p)

    # Weights/biases: full block + constant index_map -> DMA'd once, VMEM-resident.
    w_specs = [pl.BlockSpec(w.shape, lambda i: (0, 0)) for w in weights]

    out = pl.pallas_call(
        hybrid_kernel,
        out_shape=jax.ShapeDtypeStruct((b_pad, LANES), jnp.float32),
        grid_spec=pltpu.PrefetchScalarGridSpec(
            num_scalar_prefetch=0,
            grid=grid,
            in_specs=[pl.BlockSpec((tb, feat), lambda i: (i, 0)),
                      pl.BlockSpec((tb, LANES), lambda i: (i, 0))] + w_specs,
            out_specs=pl.BlockSpec((tb, LANES), lambda i: (i, 0)),
        ),
        compiler_params=pltpu.CompilerParams(
            dimension_semantics=("parallel",),
            vmem_limit_bytes=32 * 1024 * 1024),
    )(x2, morph_p, *weights)

    return out[:B, :num_classes]


def init_params(key, c_in=3, base_feat=64, num_classes=3):
    """Deterministic PyTorch-style (uniform +-1/sqrt(fan_in)) init.

    Weights are stored transposed, i.e. (in, out), so y = x @ W + b matches
    PyTorch's y = x @ weight.T + bias.  Biases are (1, out) for broadcasting.
    """
    ks = list(jax.random.split(key, 8))

    def lin(k, fan_in, fan_out):
        kw, kb = jax.random.split(k)
        lim = 1.0 / math.sqrt(fan_in)
        w = jax.random.uniform(kw, (fan_in, fan_out), jnp.float32, -lim, lim)
        b = jax.random.uniform(kb, (1, fan_out), jnp.float32, -lim, lim)
        return w, b

    wb, bb = lin(ks[0], c_in, base_feat)          # synthetic frozen base model head
    wbp, bbp = lin(ks[1], base_feat, 128)         # base_proj
    wmp, bmp = lin(ks[2], MORPH_DIM, 128)         # morph_proj
    wg1, bg1 = lin(ks[3], 256, 64)                # gate Linear(128*2, 64)
    wg2, bg2 = lin(ks[4], 64, 1)                  # gate Linear(64, 1)
    wc1, bc1 = lin(ks[5], 128, 64)                # classifier Linear(128, 64)
    wc2, bc2 = lin(ks[6], 64, num_classes)        # classifier Linear(64, C)

    return dict(
        wb=wb, bb=bb,
        wbp=wbp, bbp=bbp,
        wmp=wmp, bmp=bmp,
        wg1b=wg1[:128], wg1m=wg1[128:], bg1=bg1,   # split of the concat Linear
        wg2=wg2, bg2=bg2,
        wc1=wc1, bc1=bc1,
        wc2=wc2, bc2=bc2,
    )


def reference_forward(x, morph, p):
    """Plain-JAX f32 reference matching the PyTorch forward semantics."""
    pooled = jnp.mean(x.reshape(x.shape[0], x.shape[1], -1), axis=-1)
    base_out = pooled @ p["wb"] + p["bb"]
    base_proj = base_out @ p["wbp"] + p["bbp"]
    morph_proj = morph @ p["wmp"] + p["bmp"]
    gate_in = jnp.concatenate([base_proj, morph_proj], axis=1)
    wg1 = jnp.concatenate([p["wg1b"], p["wg1m"]], axis=0)
    g = jax.nn.relu(gate_in @ wg1 + p["bg1"])
    gate_w = jax.nn.sigmoid(g @ p["wg2"] + p["bg2"])
    gated = gate_w * morph_proj + (1.0 - gate_w) * base_proj
    h = jax.nn.relu(gated @ p["wc1"] + p["bc1"])
    return h @ p["wc2"] + p["bc2"]


if __name__ == "__main__":
    key = jax.random.PRNGKey(0)
    k_x, k_m, k_p = jax.random.split(key, 3)

    B, Cin, H, W = 2, 3, 16, 16
    num_classes = 3

    x = jax.random.normal(k_x, (B, Cin, H, W), jnp.float32)   # NCHW, like PyTorch
    # TODO(synk): cv2 connectedComponents / erode morphological feature extraction
    # has no Pallas equivalent; use deterministic synthetic 24-dim morph features.
    morph = jax.random.normal(k_m, (B, MORPH_DIM), jnp.float32)

    params = init_params(k_p, c_in=Cin, base_feat=64, num_classes=num_classes)

    out = hybrid_forward(x, morph, params, num_classes)
    out = jax.block_until_ready(out)

    ref = reference_forward(x, morph, params)
    assert out.shape == (B, num_classes)
    # bf16 cast of x / base weight (HBM-bandwidth optimization) vs the pure-f32
    # reference -> slightly looser tolerance than a bit-exact f32 path.
    assert jnp.allclose(out, ref, atol=1e-2, rtol=1e-2), float(jnp.max(jnp.abs(out - ref)))

    print("KERNEL_OK")
</pallas_src>

<mosaic_0001>
module attributes {stable_mosaic.version = 11 : i64} {
  func.func @hybrid_kernel(%arg0: i32, %arg1: memref<2x768xbf16, #tpu.memory_space<vmem>>, %arg2: memref<2x128xf32, #tpu.memory_space<vmem>>, %arg3: memref<768x64xbf16, #tpu.memory_space<vmem>>, %arg4: memref<1x64xf32, #tpu.memory_space<vmem>>, %arg5: memref<64x128xf32, #tpu.memory_space<vmem>>, %arg6: memref<1x128xf32, #tpu.memory_space<vmem>>, %arg7: memref<128x128xf32, #tpu.memory_space<vmem>>, %arg8: memref<1x128xf32, #tpu.memory_space<vmem>>, %arg9: memref<128x64xf32, #tpu.memory_space<vmem>>, %arg10: memref<128x64xf32, #tpu.memory_space<vmem>>, %arg11: memref<1x64xf32, #tpu.memory_space<vmem>>, %arg12: memref<1x64xf32, #tpu.memory_space<vmem>>, %arg13: memref<1x1xf32, #tpu.memory_space<vmem>>, %arg14: memref<128x64xf32, #tpu.memory_space<vmem>>, %arg15: memref<1x64xf32, #tpu.memory_space<vmem>>, %arg16: memref<64x128xf32, #tpu.memory_space<vmem>>, %arg17: memref<1x128xf32, #tpu.memory_space<vmem>>, %arg18: memref<2x128xf32, #tpu.memory_space<vmem>>) attributes {dimension_semantics = [#tpu.dimension_semantics<parallel>], iteration_bounds = array<i64: 1>, scalar_prefetch = 0 : i64, scratch_operands = 0 : i64, tpu.core_type = #tpu.core_type<tc>, window_params = [{transform_indices = @transform_0, window_bounds = array<i64: 2, 768>}, {transform_indices = @transform_1, window_bounds = array<i64: 2, 128>}, {pipeline_mode = #tpu.pipeline_mode<synchronous>, transform_indices = @transform_2, window_bounds = array<i64: 768, 64>}, {pipeline_mode = #tpu.pipeline_mode<synchronous>, transform_indices = @transform_3, window_bounds = array<i64: 1, 64>}, {pipeline_mode = #tpu.pipeline_mode<synchronous>, transform_indices = @transform_4, window_bounds = array<i64: 64, 128>}, {pipeline_mode = #tpu.pipeline_mode<synchronous>, transform_indices = @transform_5, window_bounds = array<i64: 1, 128>}, {pipeline_mode = #tpu.pipeline_mode<synchronous>, transform_indices = @transform_6, window_bounds = array<i64: 128, 128>}, {pipeline_mode = #tpu.pipeline_mode<synchronous>, transform_indices = @transform_7, window_bounds = array<i64: 1, 128>}, {pipeline_mode = #tpu.pipeline_mode<synchronous>, transform_indices = @transform_8, window_bounds = array<i64: 128, 64>}, {pipeline_mode = #tpu.pipeline_mode<synchronous>, transform_indices = @transform_9, window_bounds = array<i64: 128, 64>}, {pipeline_mode = #tpu.pipeline_mode<synchronous>, transform_indices = @transform_10, window_bounds = array<i64: 1, 64>}, {pipeline_mode = #tpu.pipeline_mode<synchronous>, transform_indices = @transform_11, window_bounds = array<i64: 1, 64>}, {pipeline_mode = #tpu.pipeline_mode<synchronous>, transform_indices = @transform_12, window_bounds = array<i64: 1, 1>}, {pipeline_mode = #tpu.pipeline_mode<synchronous>, transform_indices = @transform_13, window_bounds = array<i64: 128, 64>}, {pipeline_mode = #tpu.pipeline_mode<synchronous>, transform_indices = @transform_14, window_bounds = array<i64: 1, 64>}, {pipeline_mode = #tpu.pipeline_mode<synchronous>, transform_indices = @transform_15, window_bounds = array<i64: 64, 128>}, {pipeline_mode = #tpu.pipeline_mode<synchronous>, transform_indices = @transform_16, window_bounds = array<i64: 1, 128>}, {transform_indices = @transform_17, window_bounds = array<i64: 2, 128>}]} {
    %c0 = arith.constant 0 : index
    %c0_0 = arith.constant 0 : index
    %0 = vector.load %arg1[%c0, %c0_0] : memref<2x768xbf16, #tpu.memory_space<vmem>>, vector<2x768xbf16>
    %c0_1 = arith.constant 0 : index
    %c0_2 = arith.constant 0 : index
    %1 = vector.load %arg3[%c0_1, %c0_2] : memref<768x64xbf16, #tpu.memory_space<vmem>>, vector<768x64xbf16>
    %cst = arith.constant dense<0.000000e+00> : vector<2x64xf32>
    %2 = tpu.matmul %0, %1, %cst {dimension_numbers = #tpu.dot_dimension_numbers<[1], [0], [0], [1], [0, 0, 1, 1], [], []>} : vector<2x768xbf16>, vector<768x64xbf16>, vector<2x64xf32> -> vector<2x64xf32>
    %c0_3 = arith.constant 0 : index
    %c0_4 = arith.constant 0 : index
    %3 = vector.load %arg4[%c0_3, %c0_4] : memref<1x64xf32, #tpu.memory_space<vmem>>, vector<1x64xf32>
    %4 = vector.broadcast %3 : vector<1x64xf32> to vector<2x64xf32>
    %5 = arith.addf %2, %4 : vector<2x64xf32>
    %c0_5 = arith.constant 0 : index
    %c0_6 = arith.constant 0 : index
    %6 = vector.load %arg5[%c0_5, %c0_6] : memref<64x128xf32, #tpu.memory_space<vmem>>, vector<64x128xf32>
    %cst_7 = arith.constant dense<0.000000e+00> : vector<2x128xf32>
    %7 = tpu.matmul %5, %6, %cst_7 {dimension_numbers = #tpu.dot_dimension_numbers<[1], [0], [0], [1], [0, 0, 1, 1], [], []>} : vector<2x64xf32>, vector<64x128xf32>, vector<2x128xf32> -> vector<2x128xf32>
    %c0_8 = arith.constant 0 : index
    %c0_9 = arith.constant 0 : index
    %8 = vector.load %arg6[%c0_8, %c0_9] : memref<1x128xf32, #tpu.memory_space<vmem>>, vector<1x128xf32>
    %9 = vector.broadcast %8 : vector<1x128xf32> to vector<2x128xf32>
    %10 = arith.addf %7, %9 : vector<2x128xf32>
    %c0_10 = arith.constant 0 : index
    %c0_11 = arith.constant 0 : index
    %11 = vector.load %arg2[%c0_10, %c0_11] : memref<2x128xf32, #tpu.memory_space<vmem>>, vector<2x128xf32>
    %c0_12 = arith.constant 0 : index
    %c0_13 = arith.constant 0 : index
    %12 = vector.load %arg7[%c0_12, %c0_13] : memref<128x128xf32, #tpu.memory_space<vmem>>, vector<128x128xf32>
    %cst_14 = arith.constant dense<0.000000e+00> : vector<2x128xf32>
    %13 = tpu.matmul %11, %12, %cst_14 {dimension_numbers = #tpu.dot_dimension_numbers<[1], [0], [0], [1], [0, 0, 1, 1], [], []>} : vector<2x128xf32>, vector<128x128xf32>, vector<2x128xf32> -> vector<2x128xf32>
    %c0_15 = arith.constant 0 : index
    %c0_16 = arith.constant 0 : index
    %14 = vector.load %arg8[%c0_15, %c0_16] : memref<1x128xf32, #tpu.memory_space<vmem>>, vector<1x128xf32>
    %15 = vector.broadcast %14 : vector<1x128xf32> to vector<2x128xf32>
    %16 = arith.addf %13, %15 : vector<2x128xf32>
    %c0_17 = arith.constant 0 : index
    %c0_18 = arith.constant 0 : index
    %17 = vector.load %arg9[%c0_17, %c0_18] : memref<128x64xf32, #tpu.memory_space<vmem>>, vector<128x64xf32>
    %cst_19 = arith.constant dense<0.000000e+00> : vector<2x64xf32>
    %18 = tpu.matmul %10, %17, %cst_19 {dimension_numbers = #tpu.dot_dimension_numbers<[1], [0], [0], [1], [0, 0, 1, 1], [], []>} : vector<2x128xf32>, vector<128x64xf32>, vector<2x64xf32> -> vector<2x64xf32>
    %c0_20 = arith.constant 0 : index
    %c0_21 = arith.constant 0 : index
    %19 = vector.load %arg10[%c0_20, %c0_21] : memref<128x64xf32, #tpu.memory_space<vmem>>, vector<128x64xf32>
    %cst_22 = arith.constant dense<0.000000e+00> : vector<2x64xf32>
    %20 = tpu.matmul %16, %19, %cst_22 {dimension_numbers = #tpu.dot_dimension_numbers<[1], [0], [0], [1], [0, 0, 1, 1], [], []>} : vector<2x128xf32>, vector<128x64xf32>, vector<2x64xf32> -> vector<2x64xf32>
    %21 = arith.addf %18, %20 : vector<2x64xf32>
    %c0_23 = arith.constant 0 : index
    %c0_24 = arith.constant 0 : index
    %22 = vector.load %arg11[%c0_23, %c0_24] : memref<1x64xf32, #tpu.memory_space<vmem>>, vector<1x64xf32>
    %23 = vector.broadcast %22 : vector<1x64xf32> to vector<2x64xf32>
    %24 = arith.addf %21, %23 : vector<2x64xf32>
    %cst_25 = arith.constant 0.000000e+00 : f32
    %25 = vector.broadcast %cst_25 : f32 to vector<2x64xf32>
    %26 = arith.maximumf %24, %25 : vector<2x64xf32>
    %c0_26 = arith.constant 0 : index
    %c0_27 = arith.constant 0 : index
    %27 = vector.load %arg12[%c0_26, %c0_27] : memref<1x64xf32, #tpu.memory_space<vmem>>, vector<1x64xf32>
    %28 = vector.broadcast %27 : vector<1x64xf32> to vector<2x64xf32>
    %29 = arith.mulf %26, %28 : vector<2x64xf32>
    %cst_28 = arith.constant dense<0.000000e+00> : vector<2xf32>
    %30 = vector.multi_reduction <add>, %29, %cst_28 [1] : vector<2x64xf32> to vector<2xf32>
    %31 = vector.shape_cast %30 : vector<2xf32> to vector<2x1xf32>
    %c0_29 = arith.constant 0 : index
    %c0_30 = arith.constant 0 : index
    %32 = vector.load %arg13[%c0_29, %c0_30] : memref<1x1xf32, #tpu.memory_space<vmem>>, vector<1x1xf32>
    %33 = vector.broadcast %32 : vector<1x1xf32> to vector<2x1xf32>
    %34 = arith.addf %31, %33 : vector<2x1xf32>
    %35 = arith.negf %34 : vector<2x1xf32>
    %36 = math.exp %35 : vector<2x1xf32>
    %cst_31 = arith.constant 1.000000e+00 : f32
    %37 = vector.broadcast %cst_31 : f32 to vector<2x1xf32>
    %38 = arith.addf %37, %36 : vector<2x1xf32>
    %39 = arith.divf %37, %38 : vector<2x1xf32>
    %40 = vector.broadcast %39 : vector<2x1xf32> to vector<2x128xf32>
    %41 = arith.mulf %40, %16 : vector<2x128xf32>
    %cst_32 = arith.constant 1.000000e+00 : f32
    %42 = vector.broadcast %cst_32 : f32 to vector<2x1xf32>
    %43 = arith.subf %42, %39 : vector<2x1xf32>
    %44 = vector.broadcast %43 : vector<2x1xf32> to vector<2x128xf32>
    %45 = arith.mulf %44, %10 : vector<2x128xf32>
    %46 = arith.addf %41, %45 : vector<2x128xf32>
    %c0_33 = arith.constant 0 : index
    %c0_34 = arith.constant 0 : index
    %47 = vector.load %arg14[%c0_33, %c0_34] : memref<128x64xf32, #tpu.memory_space<vmem>>, vector<128x64xf32>
    %cst_35 = arith.constant dense<0.000000e+00> : vector<2x64xf32>
    %48 = tpu.matmul %46, %47, %cst_35 {dimension_numbers = #tpu.dot_dimension_numbers<[1], [0], [0], [1], [0, 0, 1, 1], [], []>} : vector<2x128xf32>, vector<128x64xf32>, vector<2x64xf32> -> vector<2x64xf32>
    %c0_36 = arith.constant 0 : index
    %c0_37 = arith.constant 0 : index
    %49 = vector.load %arg15[%c0_36, %c0_37] : memref<1x64xf32, #tpu.memory_space<vmem>>, vector<1x64xf32>
    %50 = vector.broadcast %49 : vector<1x64xf32> to vector<2x64xf32>
    %51 = arith.addf %48, %50 : vector<2x64xf32>
    %cst_38 = arith.constant 0.000000e+00 : f32
    %52 = vector.broadcast %cst_38 : f32 to vector<2x64xf32>
    %53 = arith.maximumf %51, %52 : vector<2x64xf32>
    %c0_39 = arith.constant 0 : index
    %c0_40 = arith.constant 0 : index
    %54 = vector.load %arg16[%c0_39, %c0_40] : memref<64x128xf32, #tpu.memory_space<vmem>>, vector<64x128xf32>
    %cst_41 = arith.constant dense<0.000000e+00> : vector<2x128xf32>
    %55 = tpu.matmul %53, %54, %cst_41 {dimension_numbers = #tpu.dot_dimension_numbers<[1], [0], [0], [1], [0, 0, 1, 1], [], []>} : vector<2x64xf32>, vector<64x128xf32>, vector<2x128xf32> -> vector<2x128xf32>
    %c0_42 = arith.constant 0 : index
    %c0_43 = arith.constant 0 : index
    %56 = vector.load %arg17[%c0_42, %c0_43] : memref<1x128xf32, #tpu.memory_space<vmem>>, vector<1x128xf32>
    %57 = vector.broadcast %56 : vector<1x128xf32> to vector<2x128xf32>
    %58 = arith.addf %55, %57 : vector<2x128xf32>
    %c0_44 = arith.constant 0 : index
    %c0_45 = arith.constant 0 : index
    %59 = vector.load %arg18[%c0_44, %c0_45] : memref<2x128xf32, #tpu.memory_space<vmem>>, vector<2x128xf32>
    tpu.vector_store %arg18[%c0_44, %c0_45], %58 {strides = array<i32>} : memref<2x128xf32, #tpu.memory_space<vmem>>, vector<2x128xf32>,
    return
  }
  func.func @transform_0(%arg0: i32) -> (i32, i32) {
    %c0_i32 = arith.constant 0 : i32
    %c0_i32_0 = arith.constant 0 : i32
    return %arg0, %c0_i32 : i32, i32
  }
  func.func @transform_1(%arg0: i32) -> (i32, i32) {
    %c0_i32 = arith.constant 0 : i32
    %c0_i32_0 = arith.constant 0 : i32
    return %arg0, %c0_i32 : i32, i32
  }
  func.func @transform_2(%arg0: i32) -> (i32, i32) {
    %c0_i32 = arith.constant 0 : i32
    %c0_i32_0 = arith.constant 0 : i32
    %c0_i32_1 = arith.constant 0 : i32
    return %c0_i32, %c0_i32_0 : i32, i32
  }
  func.func @transform_3(%arg0: i32) -> (i32, i32) {
    %c0_i32 = arith.constant 0 : i32
    %c0_i32_0 = arith.constant 0 : i32
    %c0_i32_1 = arith.constant 0 : i32
    return %c0_i32, %c0_i32_0 : i32, i32
  }
  func.func @transform_4(%arg0: i32) -> (i32, i32) {
    %c0_i32 = arith.constant 0 : i32
    %c0_i32_0 = arith.constant 0 : i32
    %c0_i32_1 = arith.constant 0 : i32
    return %c0_i32, %c0_i32_0 : i32, i32
  }
  func.func @transform_5(%arg0: i32) -> (i32, i32) {
    %c0_i32 = arith.constant 0 : i32
    %c0_i32_0 = arith.constant 0 : i32
    %c0_i32_1 = arith.constant 0 : i32
    return %c0_i32, %c0_i32_0 : i32, i32
  }
  func.func @transform_6(%arg0: i32) -> (i32, i32) {
    %c0_i32 = arith.constant 0 : i32
    %c0_i32_0 = arith.constant 0 : i32
    %c0_i32_1 = arith.constant 0 : i32
    return %c0_i32, %c0_i32_0 : i32, i32
  }
  func.func @transform_7(%arg0: i32) -> (i32, i32) {
    %c0_i32 = arith.constant 0 : i32
    %c0_i32_0 = arith.constant 0 : i32
    %c0_i32_1 = arith.constant 0 : i32
    return %c0_i32, %c0_i32_0 : i32, i32
  }
  func.func @transform_8(%arg0: i32) -> (i32, i32) {
    %c0_i32 = arith.constant 0 : i32
    %c0_i32_0 = arith.constant 0 : i32
    %c0_i32_1 = arith.constant 0 : i32
    return %c0_i32, %c0_i32_0 : i32, i32
  }
  func.func @transform_9(%arg0: i32) -> (i32, i32) {
    %c0_i32 = arith.constant 0 : i32
    %c0_i32_0 = arith.constant 0 : i32
    %c0_i32_1 = arith.constant 0 : i32
    return %c0_i32, %c0_i32_0 : i32, i32
  }
  func.func @transform_10(%arg0: i32) -> (i32, i32) {
    %c0_i32 = arith.constant 0 : i32
    %c0_i32_0 = arith.constant 0 : i32
    %c0_i32_1 = arith.constant 0 : i32
    return %c0_i32, %c0_i32_0 : i32, i32
  }
  func.func @transform_11(%arg0: i32) -> (i32, i32) {
    %c0_i32 = arith.constant 0 : i32
    %c0_i32_0 = arith.constant 0 : i32
    %c0_i32_1 = arith.constant 0 : i32
    return %c0_i32, %c0_i32_0 : i32, i32
  }
  func.func @transform_12(%arg0: i32) -> (i32, i32) {
    %c0_i32 = arith.constant 0 : i32
    %c0_i32_0 = arith.constant 0 : i32
    %c0_i32_1 = arith.constant 0 : i32
    return %c0_i32, %c0_i32_0 : i32, i32
  }
  func.func @transform_13(%arg0: i32) -> (i32, i32) {
    %c0_i32 = arith.constant 0 : i32
    %c0_i32_0 = arith.constant 0 : i32
    %c0_i32_1 = arith.constant 0 : i32
    return %c0_i32, %c0_i32_0 : i32, i32
  }
  func.func @transform_14(%arg0: i32) -> (i32, i32) {
    %c0_i32 = arith.constant 0 : i32
    %c0_i32_0 = arith.constant 0 : i32
    %c0_i32_1 = arith.constant 0 : i32
    return %c0_i32, %c0_i32_0 : i32, i32
  }
  func.func @transform_15(%arg0: i32) -> (i32, i32) {
    %c0_i32 = arith.constant 0 : i32
    %c0_i32_0 = arith.constant 0 : i32
    %c0_i32_1 = arith.constant 0 : i32
    return %c0_i32, %c0_i32_0 : i32, i32
  }
  func.func @transform_16(%arg0: i32) -> (i32, i32) {
    %c0_i32 = arith.constant 0 : i32
    %c0_i32_0 = arith.constant 0 : i32
    %c0_i32_1 = arith.constant 0 : i32
    return %c0_i32, %c0_i32_0 : i32, i32
  }
  func.func @transform_17(%arg0: i32) -> (i32, i32) {
    %c0_i32 = arith.constant 0 : i32
    %c0_i32_0 = arith.constant 0 : i32
    return %arg0, %c0_i32 : i32, i32
  }
}

</mosaic_0001>

<bundles_post_ra>
// kernel: tpu_custom_call.1
= control target key start
LH: loop header
LB: loop body
LE: loop exit
PB: predicated region body
PF: predicated region fallthrough
CT: control target
= control target key end

     0   :  { %s2405_s0 = inlined_call_operand.vmem [shape: bf16[2,768], index: 0, kind: input, shape index: {}]   ;;  %s2406_s1 = inlined_call_operand.vmem [shape: f32[2,128], index: 1, kind: input, shape index: {}]   ;;  %s2407_s2 = inlined_call_operand.vmem [shape: bf16[768,64], index: 2, kind: input, shape index: {}]   ;;  %s2408_s3 = inlined_call_operand.vmem [shape: f32[1,64], index: 3, kind: input, shape index: {}]   ;;  %s2409_s4 = inlined_call_operand.vmem [shape: f32[64,128], index: 4, kind: input, shape index: {}]   ;;  %s2410_s5 = inlined_call_operand.vmem [shape: f32[1,128], index: 5, kind: input, shape index: {}]   ;;  %s2411_s6 = inlined_call_operand.vmem [shape: f32[128,128], index: 6, kind: input, shape index: {}]   ;;  %s2412_s7 = inlined_call_operand.vmem [shape: f32[1,128], index: 7, kind: input, shape index: {}]   ;;  %s2413_s8 = inlined_call_operand.vmem [shape: f32[128,64], index: 8, kind: input, shape index: {}]   ;;  %s2414_s9 = inlined_call_operand.vmem [shape: f32[128,64], index: 9, kind: input, shape index: {}]   ;;  %s2415_s10 = inlined_call_operand.vmem [shape: f32[1,64], index: 10, kind: input, shape index: {}]   ;;  %s2416_s11 = inlined_call_operand.vmem [shape: f32[1,64], index: 11, kind: input, shape index: {}]   ;;  %s2417_s12 = inlined_call_operand.<no memory space> [shape: f32[1,1], index: 12, kind: input, shape index: {}]   ;;  %s2418_s13 = inlined_call_operand.vmem [shape: f32[128,64], index: 13, kind: input, shape index: {}]   ;;  %s2419_s14 = inlined_call_operand.vmem [shape: f32[1,64], index: 14, kind: input, shape index: {}]   ;;  %s2420_s15 = inlined_call_operand.vmem [shape: f32[64,128], index: 15, kind: input, shape index: {}]   ;;  %s2421_s16 = inlined_call_operand.vmem [shape: f32[1,128], index: 16, kind: input, shape index: {}]   ;;  %s2422_s17 = inlined_call_operand.hbm [shape: f32[2,128], index: 17, kind: output, shape index: {}]  }
   0x1   :  { %2423 = sst [smem:[#allocation6_spill]] %s2405_s0  ;;  %v22_v0 = vstv %s2417_s12 }
   0x2   :  { %2424 = sst [smem:[#allocation7_spill]] %s2406_s1  ;;  %23 = vst [vmem:[#allocation2] sm:$0x1] %v22_v0 }
   0x3   :  { %v1744_v1 = vld [vmem:[%s2407_s2 + $0x40] sm:$0xff]   ;;  %v1748_v5 = vld [vmem:[%s2407_s2 + $0x48] sm:$0xff]   ;;  %v1752_v9 = vld [vmem:[%s2407_s2 + $0x50] sm:$0xff]   ;;  %v169_v30 = vlaneseq  ;;  %s2425_s26 = sld [smem:[#allocation6_spill]]  ;;  %v1821_v34 = vmov 1966171168  }
   0x4   :  { %v1745_v2 = vld [vmem:[%s2407_s2] sm:$0xff]   ;;  %1286 = vmatprep.subr.bf16.mxu0 %v1744_v1  ;;  %v1749_v6 = vld [vmem:[%s2407_s2 + $0x8] sm:$0xff]   ;;  %v1753_v10 = vld [vmem:[%s2407_s2 + $0x10] sm:$0xff]   ;;  %v167_v35 = vunpack.c.l.s4 %v1821_v34 }
   0x5   :  { %v1746_v3 = vld [vmem:[%s2407_s2 + $0xc0] sm:$0xff]   ;;  %1287 = vmatpush3.bf16.msra.mxu0 %v1745_v2  ;;  %v1750_v7 = vld [vmem:[%s2407_s2 + $0xc8] sm:$0xff]   ;;  %v1754_v11 = vld [vmem:[%s2407_s2 + $0xd0] sm:$0xff]   ;;  %v170_v36 = vshrl.u32 %v169_v30, 7 }
   0x6   :  { %v1747_v4 = vld [vmem:[%s2407_s2 + $0x80] sm:$0xff]   ;;  %1308 = vmatprep.subr.bf16.mxu1 %v1746_v3  ;;  %1288 = vmatprep.subr.bf16.mxu0 %v1748_v5  ;;  %v1751_v8 = vld [vmem:[%s2407_s2 + $0x88] sm:$0xff]   ;;  %v1755_v12 = vld [vmem:[%s2407_s2 + $0x90] sm:$0xff]   ;;  %v168_v40 = vunpack.c.0.s8 %v167_v35 }
   0x7   :  { %1309 = vmatpush3.bf16.msra.mxu1 %v1747_v4  ;;  %v1756_v13 = vld [vmem:[%s2407_s2 + $0x58] sm:$0xff]   ;;  %v1760_v17 = vld [vmem:[%s2407_s2 + $0x60] sm:$0xff]   ;;  %v1764_v21 = vld [vmem:[%s2407_s2 + $0x68] sm:$0xff]  }
   0x8   :  { %1310 = vmatprep.subr.bf16.mxu1 %v1750_v7  ;;  %v1757_v14 = vld [vmem:[%s2407_s2 + $0x18] sm:$0xff]   ;;  %v1761_v18 = vld [vmem:[%s2407_s2 + $0x20] sm:$0xff]   ;;  %v1765_v22 = vld [vmem:[%s2407_s2 + $0x28] sm:$0xff]   ;;  %v171_v41 = vsub.s32 %v168_v40, %v170_v36 }
   0x9   :  { %1289 = vmatpush3.bf16.msra.mxu0 %v1749_v6  ;;  %v1758_v15 = vld [vmem:[%s2407_s2 + $0xd8] sm:$0xff]   ;;  %v1762_v19 = vld [vmem:[%s2407_s2 + $0xe0] sm:$0xff]   ;;  %v1766_v23 = vld [vmem:[%s2407_s2 + $0xe8] sm:$0xff]  }
   0xa   :  { %1290 = vmatprep.subr.bf16.mxu0 %v1752_v9  ;;  %v1759_v16 = vld [vmem:[%s2407_s2 + $0x98] sm:$0xff]   ;;  %v1763_v20 = vld [vmem:[%s2407_s2 + $0xa0] sm:$0xff]   ;;  %v1767_v24 = vld [vmem:[%s2407_s2 + $0xa8] sm:$0xff]  }
   0xb   :  { %1311 = vmatpush3.bf16.msra.mxu1 %v1751_v8  ;;  %v1768_v25 = vld [vmem:[%s2407_s2 + $0x70] sm:$0xff]   ;;  %v1772_v29 = vld [vmem:[%s2407_s2 + $0x78] sm:$0xff]   ;;  %v60_v33 = vld [vmem:[%s2425_s26] sm:$0x3f] }
   0xc   :  { %1312 = vmatprep.subr.bf16.mxu1 %v1754_v11  ;;  %v1769_v26 = vld [vmem:[%s2407_s2 + $0x30] sm:$0xff]   ;;  %v1773_v31 = vld [vmem:[%s2407_s2 + $0x38] sm:$0xff]   ;;  %v1777_v38 = vld [vmem:[%s2407_s2 + $0x140] sm:$0xff]   ;;  %v165_v39 = vcombine.high %v60_v33, %v60_v33  ;;  %v172_v42 = vrot.slane %v60_v33, %v171_v41 }
   0xd   :  { %1291 = vmatpush3.bf16.msra.mxu0 %v1753_v10  ;;  %v1770_v27 = vld [vmem:[%s2407_s2 + $0xf0] sm:$0xff]   ;;  %v1774_v32 = vld [vmem:[%s2407_s2 + $0xf8] sm:$0xff]   ;;  %v1778_v48 = vld [vmem:[%s2407_s2 + $0x100] sm:$0xff]  }
   0xe   :  { %1292 = vmatprep.subr.bf16.mxu0 %v1756_v13  ;;  %v1771_v28 = vld [vmem:[%s2407_s2 + $0xb0] sm:$0xff]   ;;  %v1776_v37 = vld [vmem:[%s2407_s2 + $0xb8] sm:$0xff]   ;;  %v179_v43 = vrot.slane %v165_v39, %v171_v41  ;;  %v180_v44 = vcombine.high %v172_v42, %v172_v42  ;;  %v188_v45 = vrot.slane %v172_v42, %v171_v41  ;;  %v1779_v50 = vld [vmem:[%s2407_s2 + $0x148] sm:$0xff]  }
   0xf   :  { %1313 = vmatpush3.bf16.msra.mxu1 %v1755_v12  ;;  %v1780_v53 = vld [vmem:[%s2407_s2 + $0x108] sm:$0xff]   ;;  %v1781_v54 = vld [vmem:[%s2407_s2 + $0x150] sm:$0xff]  }
  0x10   :  { %1314 = vmatprep.subr.bf16.mxu1 %v1758_v15  ;;  %v181_v46 = vcombine.high %v179_v43, %v179_v43  ;;  %v202_v47 = vrot.slane %v180_v44, %v171_v41  ;;  %v210_v49 = vcombine.high %v188_v45, %v188_v45 }
  0x11   :  { %1293 = vmatpush3.bf16.msra.mxu0 %v1757_v14 }
  0x12   :  { %1294 = vmatprep.subr.bf16.mxu0 %v1760_v17  ;;  %538 = vmatprep.mubr.bf16.mxu0 %v202_v47  ;;  %v211_v51 = vcombine.high %v202_v47, %v202_v47  ;;  %v209_v52 = vrot.slane %v181_v46, %v171_v41 }
  0x13   :  { %1315 = vmatpush3.bf16.msra.mxu1 %v1759_v16 }
  0x14   :  { %1316 = vmatprep.subr.bf16.mxu1 %v1762_v19  ;;  %578 = vmatprep.mubr.bf16.mxu1 %v211_v51 }
  0x15   :  { %1295 = vmatpush3.bf16.msra.mxu0 %v1761_v18 }
  0x16   :  { %1296 = vmatprep.subr.bf16.mxu0 %v1764_v21 }
  0x17   :  { %1317 = vmatpush3.bf16.msra.mxu1 %v1763_v20 }
  0x18   :  { %1318 = vmatprep.subr.bf16.mxu1 %v1766_v23 }
  0x19   :  { %1297 = vmatpush3.bf16.msra.mxu0 %v1765_v22 }
  0x1a   :  { %1298 = vmatprep.subr.bf16.mxu0 %v1768_v25 }
  0x1b   :  { %1319 = vmatpush3.bf16.msra.mxu1 %v1767_v24 }
  0x1c   :  { %1320 = vmatprep.subr.bf16.mxu1 %v1770_v27 }
  0x1d   :  { %1299 = vmatpush3.bf16.msra.mxu0 %v1769_v26 }
  0x1e   :  { %1300 = vmatprep.subr.bf16.mxu0 %v1772_v29 }
  0x1f   :  { %1321 = vmatpush3.bf16.msra.mxu1 %v1771_v28 }
  0x20   :  { %1322 = vmatprep.subr.bf16.mxu1 %v1774_v32 }
  0x21   :  { %1301 = vmatpush3.bf16.msra.mxu0 %v1773_v31 }
  0x22   :  { %1330 = vmatprep.subr.bf16.mxu0 %v1777_v38 }
  0x23   :  { %1323 = vmatpush3.bf16.msra.mxu1 %v1776_v37 }
  0x24   :  { %539 = vmatmul.mubr.bf16.vlgmr.msra.gmra.mrb[0].mxu0 %v188_v45 }
  0x25   :  { %1331 = vmatpush3.bf16.msra.mxu0 %v1778_v48  ;;  %618 = vmatprep.mubr.bf16.mxu0 %v209_v52 }
  0x26   :  { %579 = vmatmul.mubr.bf16.vlgmr.msra.gmra.mrb[0].mxu1 %v210_v49  ;;  %1332 = vmatprep.subr.bf16.mxu0 %v1779_v50 }
  0x27   :  { %24 = vsyncpa [#allocation4], 0  ;;  %v1782_v55 = vld [vmem:[%s2407_s2 + $0x110] sm:$0xff]   ;;  %v1783_v56 = vld [vmem:[%s2407_s2 + $0x158] sm:$0xff]   ;;  %v195_v2 = vrot.slane %v179_v43, %v171_v41  ;;  %v1822_v6 = vmov 0.0|0.0   ;;  %vm1823_vm0 = vmmov 0  }
  0x28   :  { %v1784_v57 = vld [vmem:[%s2407_s2 + $0x118] sm:$0xff]   ;;  %v1785_v58 = vld [vmem:[%s2407_s2 + $0x160] sm:$0xff]   ;;  %v1787_v60 = vld [vmem:[%s2407_s2 + $0x168] sm:$0xff]   ;;  %1616 = vmatprep.subr.bf16.mxu1 %v1822_v6  ;;  %v1824_v16 = vmov 0.0   ;;  %vm641_vm1 = vcmask 523264   ;;  %vm998_vm2 = vcmask 517120  }
  0x29   :  { %1333 = vmatpush3.bf16.msra.mxu0 %v1780_v53  ;;  %v1786_v59 = vld [vmem:[%s2407_s2 + $0x120] sm:$0xff]   ;;  %v1788_v61 = vld [vmem:[%s2407_s2 + $0x128] sm:$0xff]   ;;  %v1789_v62 = vld [vmem:[%s2407_s2 + $0x170] sm:$0xff]   ;;  %1454 = vmatprep.mubr.msk.f32.mxu1 %vm1823_vm0, %v1824_v16  ;;  %s1826_s30 = smov [#allocation3]  }
  0x2a   :  { %1334 = vmatprep.subr.bf16.mxu0 %v1781_v54  ;;  %v1790_v63 = vld [vmem:[%s2407_s2 + $0x130] sm:$0xff]   ;;  %v1791_v0 = vld [vmem:[%s2407_s2 + $0x178] sm:$0xff]   ;;  %v626_v3 = vld [vmem:[%s2409_s4] sm:$0xff]  ;;  %s1219_s18 = sshll.u32 %s1826_s30, 4  ;;  %s1220_s18 = int_to_ptr.vmem [resolvable:$true] %s1219_s18 }
  0x2b   :  { %v1792_v1 = vld [vmem:[%s2407_s2 + $0x138] sm:$0xff]   ;;  %v627_v4 = vld [vmem:[%s2409_s4 + $0x8] sm:$0xff]  ;;  %v628_v5 = vld [vmem:[%s2409_s4 + $0x10] sm:$0xff]  ;;  %p1802_p1 = scmp.lt.s32.totalorder %s1220_s18, %s1220_s18 }
  0x2c   :  { %v1617_v7 = vpack.c.bf16 %v627_v4, %v626_v3  ;;  %v629_v8 = vld [vmem:[%s2409_s4 + $0x18] sm:$0xff]  ;;  %v630_v10 = vld [vmem:[%s2409_s4 + $0x20] sm:$0xff]  ;;  %v631_v11 = vld [vmem:[%s2409_s4 + $0x28] sm:$0xff] }
  0x2d   :  { %1335 = vmatpush3.bf16.msra.mxu0 %v1782_v55  ;;  %v1620_v9 = vpack.c.bf16 %v629_v8, %v628_v5  ;;  %v1623_v12 = vpack.c.bf16 %v631_v11, %v630_v10  ;;  %v632_v13 = vld [vmem:[%s2409_s4 + $0x30] sm:$0xff]  ;;  %v633_v14 = vld [vmem:[%s2409_s4 + $0x38] sm:$0xff]  ;;  %v1227_v18 = vld [vmem:[%s2408_s3] ss:$0 sm:$0xff]  ;;  %s2426_s4 = sld [smem:[#allocation7_spill]] }
  0x2e   :  { %1336 = vmatprep.subr.bf16.mxu0 %v1783_v56  ;;  %1618 = vmatpush3.bf16.msra.mxu1 %v1617_v7  ;;  %v1626_v15 = vpack.c.bf16 %v633_v14, %v632_v13  ;;  %v716_v31 = vld [vmem:[%s2411_s6] sm:$0xff]  ;;  %v717_v32 = vld [vmem:[%s2411_s6 + $0x8] sm:$0xff]  ;;  %v718_v39 = vld [vmem:[%s2411_s6 + $0x10] sm:$0xff] }
  0x2f   :  { %1619 = vmatprep.subr.bf16.mxu1 %v1822_v6  ;;  %v1629_v37 = vpack.c.bf16 %v717_v32, %v716_v31  ;;  %v719_v40 = vld [vmem:[%s2411_s6 + $0x18] sm:$0xff]  ;;  %v720_v42 = vld [vmem:[%s2411_s6 + $0x20] sm:$0xff]  ;;  %v721_v43 = vld [vmem:[%s2411_s6 + $0x28] sm:$0xff] }
  0x30   :  { %v1632_v41 = vpack.c.bf16 %v719_v40, %v718_v39  ;;  %v1635_v44 = vpack.c.bf16 %v721_v43, %v720_v42  ;;  %v722_v45 = vld [vmem:[%s2411_s6 + $0x30] sm:$0xff]  ;;  %v723_v46 = vld [vmem:[%s2411_s6 + $0x38] sm:$0xff]  ;;  %v724_v48 = vld [vmem:[%s2411_s6 + $0x40] sm:$0xff] }
  0x31   :  { %1337 = vmatpush3.bf16.msra.mxu0 %v1784_v57  ;;  %v1638_v47 = vpack.c.bf16 %v723_v46, %v722_v45  ;;  %v725_v49 = vld [vmem:[%s2411_s6 + $0x48] sm:$0xff]  ;;  %v726_v51 = vld [vmem:[%s2411_s6 + $0x50] sm:$0xff]  ;;  %v727_v52 = vld [vmem:[%s2411_s6 + $0x58] sm:$0xff] }
  0x32   :  { %1338 = vmatprep.subr.bf16.mxu0 %v1785_v58  ;;  %1621 = vmatpush3.bf16.msra.mxu1 %v1620_v9  ;;  %v1641_v50 = vpack.c.bf16 %v725_v49, %v724_v48  ;;  %v1644_v53 = vpack.c.bf16 %v727_v52, %v726_v51  ;;  %v728_v54 = vld [vmem:[%s2411_s6 + $0x60] sm:$0xff]  ;;  %v729_v55 = vld [vmem:[%s2411_s6 + $0x68] sm:$0xff]  ;;  %v730_v57 = vld [vmem:[%s2411_s6 + $0x70] sm:$0xff] }
  0x33   :  { %1622 = vmatprep.subr.bf16.mxu1 %v1822_v6  ;;  %v1647_v56 = vpack.c.bf16 %v729_v55, %v728_v54  ;;  %v731_v58 = vld [vmem:[%s2411_s6 + $0x78] sm:$0xff]  ;;  %v813_v3 = vld [vmem:[%s2413_s8 + $0x20] sm:$0xff]  ;;  %v814_v4 = vld [vmem:[%s2413_s8 + $0x28] sm:$0xff] }
  0x34   :  { %v1683_v5 = vpack.c.bf16 %v814_v4, %v813_v3  ;;  %v815_v7 = vld [vmem:[%s2413_s8 + $0x30] sm:$0xff]  ;;  %v816_v8 = vld [vmem:[%s2413_s8 + $0x38] sm:$0xff]  ;;  %v817_v10 = vld [vmem:[%s2413_s8 + $0x40] sm:$0xff] }
  0x35   :  { %1339 = vmatpush3.bf16.msra.mxu0 %v1786_v59  ;;  %v1650_v59 = vpack.c.bf16 %v731_v58, %v730_v57  ;;  %v1686_v9 = vpack.c.bf16 %v816_v8, %v815_v7  ;;  %v818_v11 = vld [vmem:[%s2413_s8 + $0x48] sm:$0xff]  ;;  %v819_v13 = vld [vmem:[%s2413_s8 + $0x50] sm:$0xff]  ;;  %v820_v14 = vld [vmem:[%s2413_s8 + $0x58] sm:$0xff] }
  0x36   :  { %1340 = vmatprep.subr.bf16.mxu0 %v1787_v60  ;;  %1624 = vmatpush3.bf16.msra.mxu1 %v1623_v12  ;;  %v809_v60 = vld [vmem:[%s2413_s8] sm:$0xff]  ;;  %v1689_v12 = vpack.c.bf16 %v818_v11, %v817_v10  ;;  %v831_v32 = vld [vmem:[%s2414_s9 + $0x30] sm:$0xff]  ;;  %v836_v39 = vld [vmem:[%s2414_s9 + $0x58] sm:$0xff] }
  0x37   :  { %1625 = vmatprep.subr.bf16.mxu1 %v1822_v6  ;;  %v838_v42 = vld [vmem:[%s2414_s9 + $0x68] sm:$0xff]  ;;  %v840_v45 = vld [vmem:[%s2414_s9 + $0x78] sm:$0xff]  ;;  %v1278_v51 = vld [vmem:[%s2412_s7] ss:$0 sm:$0xff] }
  0x38   :  { %v1279_v58 = vld [vmem:[%s2415_s10] ss:$0 sm:$0xff]  ;;  %v1031_v3 = vld [vmem:[%s2418_s13 + $0x8] sm:$0xff]  ;;  %v1032_v4 = vld [vmem:[%s2418_s13 + $0x10] sm:$0xff] }
  0x39   :  { %1341 = vmatpush3.bf16.msra.mxu0 %v1788_v61  ;;  %v810_v61 = vld [vmem:[%s2413_s8 + $0x8] sm:$0xff]  ;;  %v1033_v7 = vld [vmem:[%s2418_s13 + $0x18] sm:$0xff] }
  0x3a   :  { %1342 = vmatprep.subr.bf16.mxu0 %v1789_v62  ;;  %1627 = vmatpush3.bf16.msra.mxu1 %v1626_v15  ;;  %v715_v62 = vld [vmem:[%s2426_s4] sm:$0x3]  ;;  %v1692_v15 = vpack.c.bf16 %v820_v14, %v819_v13  ;;  %v1704_v8 = vpack.c.bf16 %v1033_v7, %v1032_v4  ;;  %v1035_v10 = vld [vmem:[%s2418_s13 + $0x28] sm:$0xff]  ;;  %v1037_v13 = vld [vmem:[%s2418_s13 + $0x38] sm:$0xff] }
  0x3b   :  { %1628 = vmatprep.subr.bf16.mxu1 %v1822_v6 }
  0x3d   :  { %1343 = vmatpush3.bf16.msra.mxu0 %v1790_v63  ;;  %v1677_v63 = vpack.c.bf16 %v810_v61, %v809_v60 }
  0x3e   :  { %1344 = vmatprep.subr.bf16.mxu0 %v1791_v0  ;;  %v811_v0 = vld [vmem:[%s2413_s8 + $0x10] sm:$0xff] }
  0x41   :  { %1345 = vmatpush3.bf16.msra.mxu0 %v1792_v1  ;;  %v812_v1 = vld [vmem:[%s2413_s8 + $0x18] sm:$0xff] }
  0x42   :  { %1652 = vmatprep.subr.bf16.mxu0 %v1822_v6 }
  0x44   :  { %619 = vmatmul.mubr.bf16.vlgmr.msra.gmra.mrb[4].mxu0 %v195_v2  ;;  %v1680_v2 = vpack.c.bf16 %v812_v1, %v811_v0 }
  0x45   :  { %1524 = vmatprep.mubr.msk.f32.mxu0 %vm1823_vm0, %v1824_v16 }
  0xf7   :  { %v1302_v17 = vpop.f32.mrb[0].mxu0 }
  0xf8   :  { %v1303_v19 = vpop.f32.mrb[1].mxu0 }
  0xf9   :  { %v1304_v20 = vadd.f32 %v1303_v19, %v1302_v17  ;;  %v1305_v21 = vpop.f32.mrb[2].mxu0  ;;  %v1324_v22 = vpop.f32.mrb[0].mxu1  ;;  %v821_v17 = vld [vmem:[%s2413_s8 + $0x60] sm:$0xff] }
  0xfa   :  { %v1306_v23 = vpop.f32.mrb[3].mxu0  ;;  %v1325_v24 = vpop.f32.mrb[1].mxu1  ;;  %v824_v21 = vld [vmem:[%s2413_s8 + $0x78] sm:$0xff] }
  0xfb   :  { %v541_v25 = vadd.f32 %v1304_v20, %v1227_v18  ;;  %v1326_v26 = vadd.f32 %v1325_v24, %v1324_v22  ;;  %v1327_v27 = vpop.f32.mrb[2].mxu1  ;;  %v822_v18 = vld [vmem:[%s2413_s8 + $0x68] sm:$0xff]  ;;  %v823_v20 = vld [vmem:[%s2413_s8 + $0x70] sm:$0xff]  ;;  %v825_v23 = vld [vmem:[%s2414_s9] sm:$0xff] }
  0xfc   :  { %v1328_v28 = vpop.f32.mrb[3].mxu1  ;;  %v1695_v19 = vpack.c.bf16 %v822_v18, %v821_v17  ;;  %v1698_v22 = vpack.c.bf16 %v824_v21, %v823_v20  ;;  %v826_v24 = vld [vmem:[%s2414_s9 + $0x8] sm:$0xff]  ;;  %v828_v27 = vld [vmem:[%s2414_s9 + $0x18] sm:$0xff] }
  0xfd   :  { %v581_v29 = vadd.f32 %v1326_v26, %v541_v25  ;;  %v1653_v25 = vpack.c.bf16 %v826_v24, %v825_v23  ;;  %v827_v26 = vld [vmem:[%s2414_s9 + $0x10] sm:$0xff]  ;;  %v1039_v17 = vld [vmem:[%s2418_s13 + $0x48] sm:$0xff]  ;;  %v1041_v20 = vld [vmem:[%s2418_s13 + $0x58] sm:$0xff] }
  0xfe   :  { %v1656_v28 = vpack.c.bf16 %v828_v27, %v827_v26  ;;  %v1043_v23 = vld [vmem:[%s2418_s13 + $0x68] sm:$0xff] }
  0xff   :  { %1654 = vmatpush3.bf16.msra.mxu0 %v1653_v25  ;;  %v1281_v25 = vld [vmem:[#allocation2] ss:$0 sm:$0xff] }
 0x100   :  { %1655 = vmatprep.subr.bf16.mxu0 %v1822_v6 }
 0x103   :  { %1657 = vmatpush3.bf16.msra.mxu0 %v1656_v28 }
 0x104   :  { %1658 = vmatprep.subr.bf16.mxu0 %v1822_v6 }
 0x117   :  { %v1346_v30 = vpop.f32.mrb[4].mxu0 }
 0x118   :  { %v1347_v33 = vpop.f32.mrb[5].mxu0 }
 0x119   :  { %v1348_v34 = vadd.f32 %v1347_v33, %v1346_v30  ;;  %v1349_v35 = vpop.f32.mrb[6].mxu0  ;;  %v830_v30 = vld [vmem:[%s2414_s9 + $0x28] sm:$0xff]  ;;  %v832_v33 = vld [vmem:[%s2414_s9 + $0x38] sm:$0xff] }
 0x11a   :  { %v1350_v36 = vpop.f32.mrb[7].mxu0  ;;  %v833_v35 = vld [vmem:[%s2414_s9 + $0x40] sm:$0xff] }
 0x11b   :  { %v621_v38 = vadd.f32 %v1348_v34, %v581_v29  ;;  %v829_v29 = vld [vmem:[%s2414_s9 + $0x20] sm:$0xff]  ;;  %v1662_v34 = vpack.c.bf16 %v832_v33, %v831_v32  ;;  %v834_v36 = vld [vmem:[%s2414_s9 + $0x48] sm:$0xff]  ;;  %v1044_v33 = vld [vmem:[%s2418_s13 + $0x70] sm:$0xff] }
 0x11c   :  { %v1659_v31 = vpack.c.bf16 %v830_v30, %v829_v29 }
 0x11d   :  { %1455 = vmatmul.mubr.msk.f32.vlgmr.msra.gmra.mrb[4].mxu1 %vm641_vm1, %v621_v38  ;;  %v835_v38 = vld [vmem:[%s2414_s9 + $0x50] sm:$0xff] }
 0x11e   :  { %1630 = vmatpush3.bf16.msra.mxu1 %v1629_v37  ;;  %1489 = vmatprep.mubr.msk.f32.mxu1 %vm1823_vm0, %v1824_v16  ;;  %v1665_v37 = vpack.c.bf16 %v834_v36, %v833_v35  ;;  %v1668_v40 = vpack.c.bf16 %v836_v39, %v835_v38  ;;  %v1124_v36 = vld [vmem:[%s2420_s15] sm:$0xff]  ;;  %v1126_v38 = vld [vmem:[%s2420_s15 + $0x10] sm:$0xff] }
 0x11f   :  { %1631 = vmatprep.subr.bf16.mxu1 %v1822_v6  ;;  %1660 = vmatpush3.bf16.msra.mxu0 %v1659_v31 }
 0x120   :  { %1661 = vmatprep.subr.bf16.mxu0 %v1822_v6 }
 0x122   :  { %1633 = vmatpush3.bf16.msra.mxu1 %v1632_v41  ;;  %v837_v41 = vld [vmem:[%s2414_s9 + $0x60] sm:$0xff] }
 0x123   :  { %1634 = vmatprep.subr.bf16.mxu1 %v1822_v6  ;;  %1663 = vmatpush3.bf16.msra.mxu0 %v1662_v34  ;;  %v1671_v43 = vpack.c.bf16 %v838_v42, %v837_v41  ;;  %v1045_v34 = vld [vmem:[%s2418_s13 + $0x78] sm:$0xff]  ;;  %v1128_v42 = vld [vmem:[%s2420_s15 + $0x20] sm:$0xff] }
 0x124   :  { %1664 = vmatprep.subr.bf16.mxu0 %v1822_v6  ;;  %v1722_v35 = vpack.c.bf16 %v1045_v34, %v1044_v33 }
 0x126   :  { %1636 = vmatpush3.bf16.msra.mxu1 %v1635_v44  ;;  %v839_v44 = vld [vmem:[%s2414_s9 + $0x70] sm:$0xff] }
 0x127   :  { %1637 = vmatprep.subr.bf16.mxu1 %v1822_v6  ;;  %1666 = vmatpush3.bf16.msra.mxu0 %v1665_v37  ;;  %v1674_v46 = vpack.c.bf16 %v840_v45, %v839_v44  ;;  %v1125_v37 = vld [vmem:[%s2420_s15 + $0x8] sm:$0xff] }
 0x128   :  { %1667 = vmatprep.subr.bf16.mxu0 %v1822_v6  ;;  %v1725_v39 = vpack.c.bf16 %v1125_v37, %v1124_v36 }
 0x12a   :  { %1639 = vmatpush3.bf16.msra.mxu1 %v1638_v47  ;;  %v1276_v47 = vld [vmem:[%s2410_s5] ss:$0 sm:$0xff] }
 0x12b   :  { %1640 = vmatprep.subr.bf16.mxu1 %v1822_v6  ;;  %1669 = vmatpush3.bf16.msra.mxu0 %v1668_v40  ;;  %v1127_v40 = vld [vmem:[%s2420_s15 + $0x18] sm:$0xff] }
 0x12c   :  { %1670 = vmatprep.subr.bf16.mxu0 %v1822_v6  ;;  %v1728_v41 = vpack.c.bf16 %v1127_v40, %v1126_v38 }
 0x12e   :  { %1642 = vmatpush3.bf16.msra.mxu1 %v1641_v50 }
 0x12f   :  { %1643 = vmatprep.subr.bf16.mxu1 %v1822_v6  ;;  %1672 = vmatpush3.bf16.msra.mxu0 %v1671_v43  ;;  %v1129_v43 = vld [vmem:[%s2420_s15 + $0x28] sm:$0xff] }
 0x130   :  { %1673 = vmatprep.subr.bf16.mxu0 %v1822_v6  ;;  %v1731_v44 = vpack.c.bf16 %v1129_v43, %v1128_v42 }
 0x132   :  { %1645 = vmatpush3.bf16.msra.mxu1 %v1644_v53 }
 0x133   :  { %1646 = vmatprep.subr.bf16.mxu1 %v1822_v6  ;;  %1675 = vmatpush3.bf16.msra.mxu0 %v1674_v46 }
 0x134   :  { %1700 = vmatprep.subr.bf16.mxu0 %v1822_v6 }
 0x136   :  { %1648 = vmatpush3.bf16.msra.mxu1 %v1647_v56 }
 0x137   :  { %1649 = vmatprep.subr.bf16.mxu1 %v1822_v6 }
 0x13a   :  { %1651 = vmatpush3.bf16.msra.mxu1 %v1650_v59 }
 0x13b   :  { %1676 = vmatprep.subr.bf16.mxu1 %v1822_v6 }
 0x13d   :  { %1490 = vmatmul.mubr.f32.vlgmr.msra.gmra.mrb[6].mxu1 %v715_v62  ;;  %v1280_v62 = vld [vmem:[%s2416_s11] ss:$0 sm:$0xff] }
 0x13e   :  { %1678 = vmatpush3.bf16.msra.mxu1 %v1677_v63  ;;  %1559 = vmatprep.mubr.msk.f32.mxu1 %vm1823_vm0, %v1824_v16 }
 0x13f   :  { %1679 = vmatprep.subr.bf16.mxu1 %v1822_v6 }
 0x142   :  { %1681 = vmatpush3.bf16.msra.mxu1 %v1680_v2  ;;  %v1030_v2 = vld [vmem:[%s2418_s13] sm:$0xff] }
 0x143   :  { %1682 = vmatprep.subr.bf16.mxu1 %v1822_v6 }
 0x146   :  { %1684 = vmatpush3.bf16.msra.mxu1 %v1683_v5  ;;  %v1701_v5 = vpack.c.bf16 %v1031_v3, %v1030_v2 }
 0x147   :  { %1685 = vmatprep.subr.bf16.mxu1 %v1822_v6 }
 0x14a   :  { %1687 = vmatpush3.bf16.msra.mxu1 %v1686_v9  ;;  %v1034_v9 = vld [vmem:[%s2418_s13 + $0x20] sm:$0xff] }
 0x14b   :  { %1688 = vmatprep.subr.bf16.mxu1 %v1822_v6  ;;  %v1707_v11 = vpack.c.bf16 %v1035_v10, %v1034_v9 }
 0x14e   :  { %1690 = vmatpush3.bf16.msra.mxu1 %v1689_v12  ;;  %v1036_v12 = vld [vmem:[%s2418_s13 + $0x30] sm:$0xff] }
 0x14f   :  { %1691 = vmatprep.subr.bf16.mxu1 %v1822_v6  ;;  %v1710_v14 = vpack.c.bf16 %v1037_v13, %v1036_v12 }
 0x152   :  { %1693 = vmatpush3.bf16.msra.mxu1 %v1692_v15  ;;  %v1038_v15 = vld [vmem:[%s2418_s13 + $0x40] sm:$0xff] }
 0x153   :  { %1694 = vmatprep.subr.bf16.mxu1 %v1822_v6  ;;  %v1713_v18 = vpack.c.bf16 %v1039_v17, %v1038_v15 }
 0x156   :  { %1696 = vmatpush3.bf16.msra.mxu1 %v1695_v19  ;;  %v1040_v19 = vld [vmem:[%s2418_s13 + $0x50] sm:$0xff] }
 0x157   :  { %1697 = vmatprep.subr.bf16.mxu1 %v1822_v6  ;;  %v1716_v21 = vpack.c.bf16 %v1041_v20, %v1040_v19 }
 0x15a   :  { %1699 = vmatpush3.bf16.msra.mxu1 %v1698_v22  ;;  %v1042_v22 = vld [vmem:[%s2418_s13 + $0x60] sm:$0xff] }
 0x15b   :  { %1724 = vmatprep.subr.bf16.mxu1 %v1822_v6  ;;  %v1719_v24 = vpack.c.bf16 %v1043_v23, %v1042_v22 }
 0x1f0   :  { %v711_v48 = vpop.f32.mrb[4].mxu1 }
 0x1f1   :  { %v2283_v49 = vadd.f32 %v1276_v47, %v711_v48  ;;  %v1456_v50 = vpop.f32.mrb[5].mxu1 }
 0x1f3   :  { %1560 = vmatmul.mubr.f32.vlgmr.msra.gmra.mrb[8].mxu1 %v2283_v49 }
 0x1f4   :  { %1613 = vmatprep.mubr.msk.f32.mxu1 %vm1823_vm0, %v1824_v16  ;;  %1726 = vmatpush3.bf16.msra.mxu1 %v1725_v39 }
 0x1f5   :  { %1727 = vmatprep.subr.bf16.mxu1 %v1822_v6 }
 0x1f8   :  { %1729 = vmatpush3.bf16.msra.mxu1 %v1728_v41 }
 0x1f9   :  { %1730 = vmatprep.subr.bf16.mxu1 %v1822_v6 }
 0x1fc   :  { %1732 = vmatpush3.bf16.msra.mxu1 %v1731_v44 }
 0x1fd   :  { %1733 = vmatprep.subr.bf16.mxu1 %v1822_v6 }
 0x210   :  { %v805_v52 = vpop.f32.mrb[6].mxu1 }
 0x211   :  { %v2291_v53 = vadd.f32 %v1278_v51, %v805_v52  ;;  %v1491_v54 = vpop.f32.mrb[7].mxu1  ;;  %v1130_v51 = vld [vmem:[%s2420_s15 + $0x30] sm:$0xff]  ;;  %v1131_v52 = vld [vmem:[%s2420_s15 + $0x38] sm:$0xff]  ;;  %s1797_s15 = scalar_lea.vmem %s1220_s18, 32 }
 0x212   :  { %v1734_v54 = vpack.c.bf16 %v1131_v52, %v1130_v51  ;;  %p1798_p0 = scmp.ne.s32.totalorder %s1220_s18, %s1797_s15  ;;  %p1803_p2 = scmp.lt.s32.totalorder %s1797_s15, %s1797_s15 }
 0x213   :  { %1525 = vmatmul.mubr.f32.vlgmr.msra.gmra.mrb[8].mxu0 %v2291_v53 }
 0x214   :  { %1594 = vmatprep.mubr.msk.f32.mxu0 %vm1823_vm0, %v1824_v16  ;;  %v1825_v16 = vmov 0   ;;  %1702 = vmatpush3.bf16.msra.mxu0 %v1701_v5  ;;  %p1804_p3 = por %p1803_p2, %p1802_p1 }
 0x215   :  { %1742 = vset.pattern.permute.xlu0 %v1825_v16  ;;  %1743 = vset.pattern.permute.xlu1 %v1825_v16 }
 0x216   :  { %1703 = vmatprep.subr.bf16.mxu0 %v1822_v6  ;;  %1735 = vmatpush3.bf16.msra.mxu1 %v1734_v54  ;;  %p1805_p4 = pnand %p1804_p3, %p1798_p0 }
 0x218   :  { %1705 = vmatpush3.bf16.msra.mxu0 %v1704_v8 }
 0x219   :  { %1706 = vmatprep.subr.bf16.mxu0 %v1822_v6 }
 0x21c   :  { %1708 = vmatpush3.bf16.msra.mxu0 %v1707_v11 }
 0x21d   :  { %1709 = vmatprep.subr.bf16.mxu0 %v1822_v6 }
 0x220   :  { %1711 = vmatpush3.bf16.msra.mxu0 %v1710_v14 }
 0x221   :  { %1712 = vmatprep.subr.bf16.mxu0 %v1822_v6 }
 0x224   :  { %1714 = vmatpush3.bf16.msra.mxu0 %v1713_v18 }
 0x225   :  { %1715 = vmatprep.subr.bf16.mxu0 %v1822_v6 }
 0x228   :  { %1717 = vmatpush3.bf16.msra.mxu0 %v1716_v21 }
 0x229   :  { %1718 = vmatprep.subr.bf16.mxu0 %v1822_v6 }
 0x22c   :  { %1720 = vmatpush3.bf16.msra.mxu0 %v1719_v24 }
 0x22d   :  { %1721 = vmatprep.subr.bf16.mxu0 %v1822_v6  ;;  %v1283_v6 = vld [vmem:[%s2419_s14] ss:$0 sm:$0xff] }
 0x230   :  { %1723 = vmatpush3.bf16.msra.mxu0 %v1722_v35 }
 0x2c6   :  { %v977_v55 = vpop.f32.mrb[8].mxu1 }
 0x2c7   :  { %v1561_v56 = vpop.f32.mrb[9].mxu1 }
 0x2e6   :  { %v907_v57 = vpop.f32.mrb[8].mxu0 }
 0x2e7   :  { %v978_v59 = vadd.f32 %v977_v55, %v907_v57  ;;  %v1526_v60 = vpop.f32.mrb[9].mxu0  ;;  %v1284_v57 = vld [vmem:[%s2421_s16] ss:$0 sm:$0xff] }
 0x2e9   :  { %v988_v61 = vadd.f32 %v1279_v58, %v978_v59 }
 0x2eb   :  { %v989_v63 = vmax.f32 %v988_v61, 0.0 }
 0x2ed   :  { %v997_v0 = vmul.f32 %v1280_v62, %v989_v63 }
 0x2ef   :  { %v999_v1 = vsel %vm998_vm2, %v997_v0, 0.0 }
 0x2f0   :  { %1000 = vadd.xlane.f32.xlu0 %v999_v1 }
 0x37d   :  { %v1001_v26 = vpop.xlane.xlu0 %1000 }
 0x37e   :  { %v1009_v27 = vadd.f32 %v1281_v25, %v1001_v26 }
 0x380   :  { %v1282_v28 = vmul.f32 -1.442695, %v1009_v27 }
 0x382   :  { %1793 = vpow2.f32 %v1282_v28 }
 0x38c   :  { %v1794_v29 = vpop.eup %1793 }
 0x38d   :  { %v1013_v30 = vadd.f32 1.0, %v1794_v29 }
 0x38f   :  { %1795 = vrcp.f32 %v1013_v30 }
 0x399   :  { %v1796_v31 = vpop.eup %1795 }
 0x39a   :  { %1018 = vperm.xlu0 %1742, %v1796_v31   ;;  %v1022_v32 = vsub.f32 1.0, %v1796_v31 }
 0x39c   :  { %1025 = vperm.xlu1 %1743, %v1022_v32  }
 0x419   :  { %v1019_v45 = vpop.permute.xlu0 %1018 }
 0x41a   :  { %v1021_v47 = vmul.f32 %v1019_v45, %v2291_v53 }
 0x41b   :  { %v1026_v46 = vpop.permute.xlu1 %1025 }
 0x41c   :  { %v1028_v48 = vmul.f32 %v1026_v46, %v2283_v49 }
 0x41e   :  { %v1029_v50 = vadd.f32 %v1028_v48, %v1021_v47 }
 0x420   :  { %1595 = vmatmul.mubr.f32.vlgmr.msra.gmra.mrb[10].mxu0 %v1029_v50 }
 0x4f3   :  { %v1119_v55 = vpop.f32.mrb[10].mxu0 }
 0x4f4   :  { %v1120_v53 = vadd.f32 %v1283_v6, %v1119_v55  ;;  %v1596_v56 = vpop.f32.mrb[11].mxu0 }
 0x4f6   :  { %v1123_v49 = vmax.f32 %v1120_v53, 0.0 }
 0x4f8   :  { %1614 = vmatmul.mubr.msk.f32.vlgmr.msra.gmra.mrb[10].mxu1 %vm641_vm1, %v1123_v49 }
 0x5cb   :  { %v1208_v58 = vpop.f32.mrb[10].mxu1 }
 0x5cc   :  { %v1209_v59 = vadd.f32 %v1284_v57, %v1208_v58  ;;  %v1615_v60 = vpop.f32.mrb[11].mxu1 }
 0x5ce   :  { %1212 = vst [vmem:[#allocation3] sm:$0x3] %v1209_v59 }
 0x5cf   :  { %1808 = shalt.err (!%p1805_p4)
}
 0x5d0   :  { %s1809_s10 = scalar_lea.hbm %s2422_s17, 32 }
 0x5d1   :  { %p1810_p5 = scmp.ne.s32.totalorder %s2422_s17, %s1809_s10  ;;  %p1813_p6 = scmp.lt.u32.totalorder %s1809_s10, %s2422_s17 }
 0x5d3   :  { %p1815_p7 = pnand %p1813_p6, %p1810_p5 }
 0x5d5   :  { %1818 = shalt.err (!%p1815_p7)
}
 0x5d6   :  { %1222 = dma.vmem_to_hbm [thread:$0]  %s1220_s18, 32, %s2422_s17, [#allocation4]  }
 0x5d7   :  { %1819 = dma.done.wait [#allocation4], 32  }
 0x5d8   :  { %1820 = vsyncadd [#allocation4], 4294967264 }
 0x5d9   :  { %1226 = vsyncpa [#allocation4], 1 }

</bundles_post_ra>
